<compile_context>
chip_gen: v7x
topology: tpu7x:2x2x1
jax: 0.10.0
libtpu: 0.0.40
codegen_flags: <defaults>
</compile_context>

<pallas_src>
import functools
import random

import numpy as np
import jax
import jax.numpy as jnp
from jax.experimental import pallas as pl
from jax.experimental.pallas import tpu as pltpu


# ------------------------------------------------------------------ kernel ---

def _fused_autoencoder_kernel(num_layers, x_ref, *refs):
    """Fused forward of all NodeCountingLayers for one sample (lane) tile.

    x_ref : (IN0, TN) float32 — features on sublanes, samples on lanes.
    refs  : for each layer l:
              mpack_ref (OUT_l, 2*IN_l) — [:, :IN] = mask (1.0 = normal_edge),
                                           [:, IN:] = 1 - mask
              sel_ref   (OUT_l, 2)      — one-hot [min-op weight, max-op weight]
            followed by o_ref (OUT_last, TN).
    """
    o_ref = refs[-1]
    cur = x_ref[...]                                 # (W, TN)

    for l in range(num_layers):
        mp = refs[2 * l][...]                        # (OUT, 2*IN)
        sel = refs[2 * l + 1][...]                   # (OUT, 2)
        in_f = mp.shape[1] // 2

        # Running min/max accumulators over the IN axis (review item #1):
        #   max operand: normal -> x, no_edge -> 0   ==  x*m
        #   min operand: normal -> x, no_edge -> 1   ==  x*m + (1-m)
        # Static Python loop is fine at these IN sizes; for very wide layers
        # switch to lax.fori_loop(..., unroll=True) with carried accumulators.
        prod = mp[:, 0:1] * cur[0:1, :]                              # (OUT, TN)
        max_acc = prod
        min_acc = prod + mp[:, in_f:in_f + 1]
        for i in range(1, in_f):
            prod = mp[:, i:i + 1] * cur[i:i + 1, :]
            max_acc = jnp.maximum(max_acc, prod)
            min_acc = jnp.minimum(min_acc, prod + mp[:, in_f + i:in_f + i + 1])

        # node_values = max over operators of (one-hot selection * op result)
        cur = jnp.maximum(sel[:, 0:1] * min_acc, sel[:, 1:2] * max_acc)

    o_ref[...] = cur


# ----------------------------------------------------------------- wrapper ---

def _detect_num_tensorcores():
    """v7x has 2 TensorCores per chip; v5e/v6e have 1.  Defaults to 1."""
    try:
        kind = str(jax.devices()[0].device_kind).lower()
    except Exception:
        return 1
    return 2 if ("v7" in kind or "7x" in kind) else 1


def node_counting_autoencoder_forward(x, params, *, num_cores=None):
    """Fused autoencoder forward via one pallas_call.

    x:      (N, IN0) float32
    params: list of (mask (OUT, IN) float32 in {0,1}, sel (OUT, 2) one-hot) per layer
    returns (N, OUT_last) float32
    """
    N, in0 = x.shape
    out_last = params[-1][0].shape[0]
    if num_cores is None:
        num_cores = _detect_num_tensorcores()

    # Sample (lane) tile: the full batch on single-TC chips / small N; >=2
    # "parallel" 128-multiple blocks only when there are 2 TensorCores (v7x).
    # The 1024 cap keeps the per-block working set far under v7x's 64 MiB VMEM.
    if N <= 128:
        tile_n = N
    else:
        target = -(-N // max(1, num_cores))
        tile_n = max(128, min(1024, (target // 128) * 128))
        tile_n = min(tile_n, (N // 128) * 128)

    x_t = x.T                                        # (IN0, N): lane-dense samples

    flat_inputs = [x_t]
    in_specs = [pl.BlockSpec((in0, tile_n), lambda i: (0, i))]
    for mask, sel in params:
        out_f, in_f = mask.shape
        # Pack mask and (1 - mask) into one grid-invariant operand.
        mpack = jnp.concatenate([mask, 1.0 - mask], axis=1)          # (OUT, 2*IN)
        flat_inputs += [mpack, sel]
        in_specs += [
            pl.BlockSpec((out_f, 2 * in_f), lambda i: (0, 0)),       # grid-invariant
            pl.BlockSpec((out_f, 2), lambda i: (0, 0)),
        ]

    kernel = functools.partial(_fused_autoencoder_kernel, len(params))

    y_t = pl.pallas_call(
        kernel,
        out_shape=jax.ShapeDtypeStruct((out_last, N), jnp.float32),
        grid_spec=pltpu.PrefetchScalarGridSpec(
            num_scalar_prefetch=0,
            grid=(pl.cdiv(N, tile_n),),
            in_specs=in_specs,
            out_specs=pl.BlockSpec((out_last, tile_n), lambda i: (0, i)),
        ),
        compiler_params=pltpu.CompilerParams(
            dimension_semantics=("parallel",)),
    )(*flat_inputs)

    return y_t.T                                     # back to (N, OUT_last)


# ------------------------------------------------------ parameter generation ---

def random_edge_mask(in_size, out_size, rng):
    """Mirror NodeCountingAutoencoder.random_edges: 1.0=normal_edge, 0.0=no_edge."""
    m = np.zeros((out_size, in_size), dtype=np.float32)
    for r in range(out_size):
        row = [float(rng.randint(0, 1)) for _ in range(in_size)]
        if sum(row) == 0.0:                       # row must contain a normal edge
            row[rng.randint(0, in_size - 1)] = 1.0
        m[r, :] = row
    for c in range(in_size):                      # every column needs a normal edge
        if m[:, c].sum() == 0.0:
            m[rng.randint(0, out_size - 1), c] = 1.0
    return m


def gumbel_hard_selection(key, out_features, num_ops=2):
    """F.gumbel_softmax(zeros(out, ops), hard=True, dim=-1): one-hot per node."""
    logits = jnp.zeros((out_features, num_ops), jnp.float32)   # node_type_count init
    g = jax.random.gumbel(key, (out_features, num_ops), dtype=jnp.float32)
    idx = jnp.argmax(logits + g, axis=-1)
    return jax.nn.one_hot(idx, num_ops, dtype=jnp.float32)


def build_autoencoder_params(in_features, hidden_sizes, key, py_seed=0):
    layer_sizes = [in_features, *hidden_sizes, in_features]
    rng = random.Random(py_seed)
    params = []
    for li in range(len(layer_sizes) - 1):
        mask = jnp.asarray(
            random_edge_mask(layer_sizes[li], layer_sizes[li + 1], rng))
        key, sub = jax.random.split(key)
        sel = gumbel_hard_selection(sub, layer_sizes[li + 1])       # (OUT, 2)
        params.append((mask, sel))
    return params


# ---------------------------------------------------------- pure-JAX reference ---

def layer_ref(x, mask, sel):
    xb = x[:, None, :]
    is_edge = mask[None, :, :] > 0.5
    min_val = jnp.min(jnp.where(is_edge, xb, 1.0), axis=-1)
    max_val = jnp.max(jnp.where(is_edge, xb, 0.0), axis=-1)
    return jnp.maximum(sel[None, :, 0] * min_val, sel[None, :, 1] * max_val)


def autoencoder_ref(x, params):
    cur = x
    for mask, sel in params:
        cur = layer_ref(cur, mask, sel)
    return cur


# ------------------------------------------------------------------------ main ---

if __name__ == "__main__":
    N, IN = 256, 16
    hidden_sizes = [8]

    key = jax.random.PRNGKey(0)
    key, pkey, xkey = jax.random.split(key, 3)

    params = build_autoencoder_params(IN, hidden_sizes, pkey, py_seed=0)
    # Fuzzy-logic style inputs in [0, 1] (as the t-norm/t-conorm semantics assume).
    x = jax.random.uniform(xkey, (N, IN), dtype=jnp.float32)

    y = node_counting_autoencoder_forward(x, params)
    y = jax.block_until_ready(y)

    y_ref = autoencoder_ref(x, params)
    assert y.shape == (N, IN), y.shape
    assert jnp.allclose(y, y_ref, atol=1e-6), float(jnp.max(jnp.abs(y - y_ref)))

    print("KERNEL_OK")
</pallas_src>

<mosaic_0001>
module attributes {stable_mosaic.version = 11 : i64} {
  func.func @_fused_autoencoder_kernel(%arg0: i32, %arg1: memref<16x256xf32, #tpu.memory_space<vmem>>, %arg2: memref<8x32xf32, #tpu.memory_space<vmem>>, %arg3: memref<8x2xf32, #tpu.memory_space<vmem>>, %arg4: memref<16x16xf32, #tpu.memory_space<vmem>>, %arg5: memref<16x2xf32, #tpu.memory_space<vmem>>, %arg6: memref<16x256xf32, #tpu.memory_space<vmem>>) attributes {dimension_semantics = [#tpu.dimension_semantics<parallel>], iteration_bounds = array<i64: 1>, scalar_prefetch = 0 : i64, scratch_operands = 0 : i64, tpu.core_type = #tpu.core_type<tc>, window_params = [{transform_indices = @transform_0, window_bounds = array<i64: 16, 256>}, {pipeline_mode = #tpu.pipeline_mode<synchronous>, transform_indices = @transform_1, window_bounds = array<i64: 8, 32>}, {pipeline_mode = #tpu.pipeline_mode<synchronous>, transform_indices = @transform_2, window_bounds = array<i64: 8, 2>}, {pipeline_mode = #tpu.pipeline_mode<synchronous>, transform_indices = @transform_3, window_bounds = array<i64: 16, 16>}, {pipeline_mode = #tpu.pipeline_mode<synchronous>, transform_indices = @transform_4, window_bounds = array<i64: 16, 2>}, {transform_indices = @transform_5, window_bounds = array<i64: 16, 256>}]} {
    %c0 = arith.constant 0 : index
    %c0_0 = arith.constant 0 : index
    %0 = vector.load %arg1[%c0, %c0_0] : memref<16x256xf32, #tpu.memory_space<vmem>>, vector<16x256xf32>
    %c0_1 = arith.constant 0 : index
    %c0_2 = arith.constant 0 : index
    %1 = vector.load %arg2[%c0_1, %c0_2] : memref<8x32xf32, #tpu.memory_space<vmem>>, vector<8x32xf32>
    %c0_3 = arith.constant 0 : index
    %c0_4 = arith.constant 0 : index
    %2 = vector.load %arg3[%c0_3, %c0_4] : memref<8x2xf32, #tpu.memory_space<vmem>>, vector<8x2xf32>
    %3 = vector.extract_strided_slice %1 {offsets = [0, 0], sizes = [8, 1], strides = [1, 1]} : vector<8x32xf32> to vector<8x1xf32>
    %4 = vector.extract_strided_slice %0 {offsets = [0, 0], sizes = [1, 256], strides = [1, 1]} : vector<16x256xf32> to vector<1x256xf32>
    %5 = vector.broadcast %3 : vector<8x1xf32> to vector<8x256xf32>
    %6 = vector.broadcast %4 : vector<1x256xf32> to vector<8x256xf32>
    %7 = arith.mulf %5, %6 : vector<8x256xf32>
    %8 = vector.extract_strided_slice %1 {offsets = [0, 16], sizes = [8, 1], strides = [1, 1]} : vector<8x32xf32> to vector<8x1xf32>
    %9 = vector.broadcast %8 : vector<8x1xf32> to vector<8x256xf32>
    %10 = arith.addf %7, %9 : vector<8x256xf32>
    %11 = vector.extract_strided_slice %1 {offsets = [0, 1], sizes = [8, 1], strides = [1, 1]} : vector<8x32xf32> to vector<8x1xf32>
    %12 = vector.extract_strided_slice %0 {offsets = [1, 0], sizes = [1, 256], strides = [1, 1]} : vector<16x256xf32> to vector<1x256xf32>
    %13 = vector.broadcast %11 : vector<8x1xf32> to vector<8x256xf32>
    %14 = vector.broadcast %12 : vector<1x256xf32> to vector<8x256xf32>
    %15 = arith.mulf %13, %14 : vector<8x256xf32>
    %16 = arith.maximumf %7, %15 : vector<8x256xf32>
    %17 = vector.extract_strided_slice %1 {offsets = [0, 17], sizes = [8, 1], strides = [1, 1]} : vector<8x32xf32> to vector<8x1xf32>
    %18 = vector.broadcast %17 : vector<8x1xf32> to vector<8x256xf32>
    %19 = arith.addf %15, %18 : vector<8x256xf32>
    %20 = arith.minimumf %10, %19 : vector<8x256xf32>
    %21 = vector.extract_strided_slice %1 {offsets = [0, 2], sizes = [8, 1], strides = [1, 1]} : vector<8x32xf32> to vector<8x1xf32>
    %22 = vector.extract_strided_slice %0 {offsets = [2, 0], sizes = [1, 256], strides = [1, 1]} : vector<16x256xf32> to vector<1x256xf32>
    %23 = vector.broadcast %21 : vector<8x1xf32> to vector<8x256xf32>
    %24 = vector.broadcast %22 : vector<1x256xf32> to vector<8x256xf32>
    %25 = arith.mulf %23, %24 : vector<8x256xf32>
    %26 = arith.maximumf %16, %25 : vector<8x256xf32>
    %27 = vector.extract_strided_slice %1 {offsets = [0, 18], sizes = [8, 1], strides = [1, 1]} : vector<8x32xf32> to vector<8x1xf32>
    %28 = vector.broadcast %27 : vector<8x1xf32> to vector<8x256xf32>
    %29 = arith.addf %25, %28 : vector<8x256xf32>
    %30 = arith.minimumf %20, %29 : vector<8x256xf32>
    %31 = vector.extract_strided_slice %1 {offsets = [0, 3], sizes = [8, 1], strides = [1, 1]} : vector<8x32xf32> to vector<8x1xf32>
    %32 = vector.extract_strided_slice %0 {offsets = [3, 0], sizes = [1, 256], strides = [1, 1]} : vector<16x256xf32> to vector<1x256xf32>
    %33 = vector.broadcast %31 : vector<8x1xf32> to vector<8x256xf32>
    %34 = vector.broadcast %32 : vector<1x256xf32> to vector<8x256xf32>
    %35 = arith.mulf %33, %34 : vector<8x256xf32>
    %36 = arith.maximumf %26, %35 : vector<8x256xf32>
    %37 = vector.extract_strided_slice %1 {offsets = [0, 19], sizes = [8, 1], strides = [1, 1]} : vector<8x32xf32> to vector<8x1xf32>
    %38 = vector.broadcast %37 : vector<8x1xf32> to vector<8x256xf32>
    %39 = arith.addf %35, %38 : vector<8x256xf32>
    %40 = arith.minimumf %30, %39 : vector<8x256xf32>
    %41 = vector.extract_strided_slice %1 {offsets = [0, 4], sizes = [8, 1], strides = [1, 1]} : vector<8x32xf32> to vector<8x1xf32>
    %42 = vector.extract_strided_slice %0 {offsets = [4, 0], sizes = [1, 256], strides = [1, 1]} : vector<16x256xf32> to vector<1x256xf32>
    %43 = vector.broadcast %41 : vector<8x1xf32> to vector<8x256xf32>
    %44 = vector.broadcast %42 : vector<1x256xf32> to vector<8x256xf32>
    %45 = arith.mulf %43, %44 : vector<8x256xf32>
    %46 = arith.maximumf %36, %45 : vector<8x256xf32>
    %47 = vector.extract_strided_slice %1 {offsets = [0, 20], sizes = [8, 1], strides = [1, 1]} : vector<8x32xf32> to vector<8x1xf32>
    %48 = vector.broadcast %47 : vector<8x1xf32> to vector<8x256xf32>
    %49 = arith.addf %45, %48 : vector<8x256xf32>
    %50 = arith.minimumf %40, %49 : vector<8x256xf32>
    %51 = vector.extract_strided_slice %1 {offsets = [0, 5], sizes = [8, 1], strides = [1, 1]} : vector<8x32xf32> to vector<8x1xf32>
    %52 = vector.extract_strided_slice %0 {offsets = [5, 0], sizes = [1, 256], strides = [1, 1]} : vector<16x256xf32> to vector<1x256xf32>
    %53 = vector.broadcast %51 : vector<8x1xf32> to vector<8x256xf32>
    %54 = vector.broadcast %52 : vector<1x256xf32> to vector<8x256xf32>
    %55 = arith.mulf %53, %54 : vector<8x256xf32>
    %56 = arith.maximumf %46, %55 : vector<8x256xf32>
    %57 = vector.extract_strided_slice %1 {offsets = [0, 21], sizes = [8, 1], strides = [1, 1]} : vector<8x32xf32> to vector<8x1xf32>
    %58 = vector.broadcast %57 : vector<8x1xf32> to vector<8x256xf32>
    %59 = arith.addf %55, %58 : vector<8x256xf32>
    %60 = arith.minimumf %50, %59 : vector<8x256xf32>
    %61 = vector.extract_strided_slice %1 {offsets = [0, 6], sizes = [8, 1], strides = [1, 1]} : vector<8x32xf32> to vector<8x1xf32>
    %62 = vector.extract_strided_slice %0 {offsets = [6, 0], sizes = [1, 256], strides = [1, 1]} : vector<16x256xf32> to vector<1x256xf32>
    %63 = vector.broadcast %61 : vector<8x1xf32> to vector<8x256xf32>
    %64 = vector.broadcast %62 : vector<1x256xf32> to vector<8x256xf32>
    %65 = arith.mulf %63, %64 : vector<8x256xf32>
    %66 = arith.maximumf %56, %65 : vector<8x256xf32>
    %67 = vector.extract_strided_slice %1 {offsets = [0, 22], sizes = [8, 1], strides = [1, 1]} : vector<8x32xf32> to vector<8x1xf32>
    %68 = vector.broadcast %67 : vector<8x1xf32> to vector<8x256xf32>
    %69 = arith.addf %65, %68 : vector<8x256xf32>
    %70 = arith.minimumf %60, %69 : vector<8x256xf32>
    %71 = vector.extract_strided_slice %1 {offsets = [0, 7], sizes = [8, 1], strides = [1, 1]} : vector<8x32xf32> to vector<8x1xf32>
    %72 = vector.extract_strided_slice %0 {offsets = [7, 0], sizes = [1, 256], strides = [1, 1]} : vector<16x256xf32> to vector<1x256xf32>
    %73 = vector.broadcast %71 : vector<8x1xf32> to vector<8x256xf32>
    %74 = vector.broadcast %72 : vector<1x256xf32> to vector<8x256xf32>
    %75 = arith.mulf %73, %74 : vector<8x256xf32>
    %76 = arith.maximumf %66, %75 : vector<8x256xf32>
    %77 = vector.extract_strided_slice %1 {offsets = [0, 23], sizes = [8, 1], strides = [1, 1]} : vector<8x32xf32> to vector<8x1xf32>
    %78 = vector.broadcast %77 : vector<8x1xf32> to vector<8x256xf32>
    %79 = arith.addf %75, %78 : vector<8x256xf32>
    %80 = arith.minimumf %70, %79 : vector<8x256xf32>
    %81 = vector.extract_strided_slice %1 {offsets = [0, 8], sizes = [8, 1], strides = [1, 1]} : vector<8x32xf32> to vector<8x1xf32>
    %82 = vector.extract_strided_slice %0 {offsets = [8, 0], sizes = [1, 256], strides = [1, 1]} : vector<16x256xf32> to vector<1x256xf32>
    %83 = vector.broadcast %81 : vector<8x1xf32> to vector<8x256xf32>
    %84 = vector.broadcast %82 : vector<1x256xf32> to vector<8x256xf32>
    %85 = arith.mulf %83, %84 : vector<8x256xf32>
    %86 = arith.maximumf %76, %85 : vector<8x256xf32>
    %87 = vector.extract_strided_slice %1 {offsets = [0, 24], sizes = [8, 1], strides = [1, 1]} : vector<8x32xf32> to vector<8x1xf32>
    %88 = vector.broadcast %87 : vector<8x1xf32> to vector<8x256xf32>
    %89 = arith.addf %85, %88 : vector<8x256xf32>
    %90 = arith.minimumf %80, %89 : vector<8x256xf32>
    %91 = vector.extract_strided_slice %1 {offsets = [0, 9], sizes = [8, 1], strides = [1, 1]} : vector<8x32xf32> to vector<8x1xf32>
    %92 = vector.extract_strided_slice %0 {offsets = [9, 0], sizes = [1, 256], strides = [1, 1]} : vector<16x256xf32> to vector<1x256xf32>
    %93 = vector.broadcast %91 : vector<8x1xf32> to vector<8x256xf32>
    %94 = vector.broadcast %92 : vector<1x256xf32> to vector<8x256xf32>
    %95 = arith.mulf %93, %94 : vector<8x256xf32>
    %96 = arith.maximumf %86, %95 : vector<8x256xf32>
    %97 = vector.extract_strided_slice %1 {offsets = [0, 25], sizes = [8, 1], strides = [1, 1]} : vector<8x32xf32> to vector<8x1xf32>
    %98 = vector.broadcast %97 : vector<8x1xf32> to vector<8x256xf32>
    %99 = arith.addf %95, %98 : vector<8x256xf32>
    %100 = arith.minimumf %90, %99 : vector<8x256xf32>
    %101 = vector.extract_strided_slice %1 {offsets = [0, 10], sizes = [8, 1], strides = [1, 1]} : vector<8x32xf32> to vector<8x1xf32>
    %102 = vector.extract_strided_slice %0 {offsets = [10, 0], sizes = [1, 256], strides = [1, 1]} : vector<16x256xf32> to vector<1x256xf32>
    %103 = vector.broadcast %101 : vector<8x1xf32> to vector<8x256xf32>
    %104 = vector.broadcast %102 : vector<1x256xf32> to vector<8x256xf32>
    %105 = arith.mulf %103, %104 : vector<8x256xf32>
    %106 = arith.maximumf %96, %105 : vector<8x256xf32>
    %107 = vector.extract_strided_slice %1 {offsets = [0, 26], sizes = [8, 1], strides = [1, 1]} : vector<8x32xf32> to vector<8x1xf32>
    %108 = vector.broadcast %107 : vector<8x1xf32> to vector<8x256xf32>
    %109 = arith.addf %105, %108 : vector<8x256xf32>
    %110 = arith.minimumf %100, %109 : vector<8x256xf32>
    %111 = vector.extract_strided_slice %1 {offsets = [0, 11], sizes = [8, 1], strides = [1, 1]} : vector<8x32xf32> to vector<8x1xf32>
    %112 = vector.extract_strided_slice %0 {offsets = [11, 0], sizes = [1, 256], strides = [1, 1]} : vector<16x256xf32> to vector<1x256xf32>
    %113 = vector.broadcast %111 : vector<8x1xf32> to vector<8x256xf32>
    %114 = vector.broadcast %112 : vector<1x256xf32> to vector<8x256xf32>
    %115 = arith.mulf %113, %114 : vector<8x256xf32>
    %116 = arith.maximumf %106, %115 : vector<8x256xf32>
    %117 = vector.extract_strided_slice %1 {offsets = [0, 27], sizes = [8, 1], strides = [1, 1]} : vector<8x32xf32> to vector<8x1xf32>
    %118 = vector.broadcast %117 : vector<8x1xf32> to vector<8x256xf32>
    %119 = arith.addf %115, %118 : vector<8x256xf32>
    %120 = arith.minimumf %110, %119 : vector<8x256xf32>
    %121 = vector.extract_strided_slice %1 {offsets = [0, 12], sizes = [8, 1], strides = [1, 1]} : vector<8x32xf32> to vector<8x1xf32>
    %122 = vector.extract_strided_slice %0 {offsets = [12, 0], sizes = [1, 256], strides = [1, 1]} : vector<16x256xf32> to vector<1x256xf32>
    %123 = vector.broadcast %121 : vector<8x1xf32> to vector<8x256xf32>
    %124 = vector.broadcast %122 : vector<1x256xf32> to vector<8x256xf32>
    %125 = arith.mulf %123, %124 : vector<8x256xf32>
    %126 = arith.maximumf %116, %125 : vector<8x256xf32>
    %127 = vector.extract_strided_slice %1 {offsets = [0, 28], sizes = [8, 1], strides = [1, 1]} : vector<8x32xf32> to vector<8x1xf32>
    %128 = vector.broadcast %127 : vector<8x1xf32> to vector<8x256xf32>
    %129 = arith.addf %125, %128 : vector<8x256xf32>
    %130 = arith.minimumf %120, %129 : vector<8x256xf32>
    %131 = vector.extract_strided_slice %1 {offsets = [0, 13], sizes = [8, 1], strides = [1, 1]} : vector<8x32xf32> to vector<8x1xf32>
    %132 = vector.extract_strided_slice %0 {offsets = [13, 0], sizes = [1, 256], strides = [1, 1]} : vector<16x256xf32> to vector<1x256xf32>
    %133 = vector.broadcast %131 : vector<8x1xf32> to vector<8x256xf32>
    %134 = vector.broadcast %132 : vector<1x256xf32> to vector<8x256xf32>
    %135 = arith.mulf %133, %134 : vector<8x256xf32>
    %136 = arith.maximumf %126, %135 : vector<8x256xf32>
    %137 = vector.extract_strided_slice %1 {offsets = [0, 29], sizes = [8, 1], strides = [1, 1]} : vector<8x32xf32> to vector<8x1xf32>
    %138 = vector.broadcast %137 : vector<8x1xf32> to vector<8x256xf32>
    %139 = arith.addf %135, %138 : vector<8x256xf32>
    %140 = arith.minimumf %130, %139 : vector<8x256xf32>
    %141 = vector.extract_strided_slice %1 {offsets = [0, 14], sizes = [8, 1], strides = [1, 1]} : vector<8x32xf32> to vector<8x1xf32>
    %142 = vector.extract_strided_slice %0 {offsets = [14, 0], sizes = [1, 256], strides = [1, 1]} : vector<16x256xf32> to vector<1x256xf32>
    %143 = vector.broadcast %141 : vector<8x1xf32> to vector<8x256xf32>
    %144 = vector.broadcast %142 : vector<1x256xf32> to vector<8x256xf32>
    %145 = arith.mulf %143, %144 : vector<8x256xf32>
    %146 = arith.maximumf %136, %145 : vector<8x256xf32>
    %147 = vector.extract_strided_slice %1 {offsets = [0, 30], sizes = [8, 1], strides = [1, 1]} : vector<8x32xf32> to vector<8x1xf32>
    %148 = vector.broadcast %147 : vector<8x1xf32> to vector<8x256xf32>
    %149 = arith.addf %145, %148 : vector<8x256xf32>
    %150 = arith.minimumf %140, %149 : vector<8x256xf32>
    %151 = vector.extract_strided_slice %1 {offsets = [0, 15], sizes = [8, 1], strides = [1, 1]} : vector<8x32xf32> to vector<8x1xf32>
    %152 = vector.extract_strided_slice %0 {offsets = [15, 0], sizes = [1, 256], strides = [1, 1]} : vector<16x256xf32> to vector<1x256xf32>
    %153 = vector.broadcast %151 : vector<8x1xf32> to vector<8x256xf32>
    %154 = vector.broadcast %152 : vector<1x256xf32> to vector<8x256xf32>
    %155 = arith.mulf %153, %154 : vector<8x256xf32>
    %156 = arith.maximumf %146, %155 : vector<8x256xf32>
    %157 = vector.extract_strided_slice %1 {offsets = [0, 31], sizes = [8, 1], strides = [1, 1]} : vector<8x32xf32> to vector<8x1xf32>
    %158 = vector.broadcast %157 : vector<8x1xf32> to vector<8x256xf32>
    %159 = arith.addf %155, %158 : vector<8x256xf32>
    %160 = arith.minimumf %150, %159 : vector<8x256xf32>
    %161 = vector.extract_strided_slice %2 {offsets = [0, 0], sizes = [8, 1], strides = [1, 1]} : vector<8x2xf32> to vector<8x1xf32>
    %162 = vector.broadcast %161 : vector<8x1xf32> to vector<8x256xf32>
    %163 = arith.mulf %162, %160 : vector<8x256xf32>
    %164 = vector.extract_strided_slice %2 {offsets = [0, 1], sizes = [8, 1], strides = [1, 1]} : vector<8x2xf32> to vector<8x1xf32>
    %165 = vector.broadcast %164 : vector<8x1xf32> to vector<8x256xf32>
    %166 = arith.mulf %165, %156 : vector<8x256xf32>
    %167 = arith.maximumf %163, %166 : vector<8x256xf32>
    %c0_5 = arith.constant 0 : index
    %c0_6 = arith.constant 0 : index
    %168 = vector.load %arg4[%c0_5, %c0_6] : memref<16x16xf32, #tpu.memory_space<vmem>>, vector<16x16xf32>
    %c0_7 = arith.constant 0 : index
    %c0_8 = arith.constant 0 : index
    %169 = vector.load %arg5[%c0_7, %c0_8] : memref<16x2xf32, #tpu.memory_space<vmem>>, vector<16x2xf32>
    %170 = vector.extract_strided_slice %168 {offsets = [0, 0], sizes = [16, 1], strides = [1, 1]} : vector<16x16xf32> to vector<16x1xf32>
    %171 = vector.extract_strided_slice %167 {offsets = [0, 0], sizes = [1, 256], strides = [1, 1]} : vector<8x256xf32> to vector<1x256xf32>
    %172 = vector.broadcast %170 : vector<16x1xf32> to vector<16x256xf32>
    %173 = vector.broadcast %171 : vector<1x256xf32> to vector<16x256xf32>
    %174 = arith.mulf %172, %173 : vector<16x256xf32>
    %175 = vector.extract_strided_slice %168 {offsets = [0, 8], sizes = [16, 1], strides = [1, 1]} : vector<16x16xf32> to vector<16x1xf32>
    %176 = vector.broadcast %175 : vector<16x1xf32> to vector<16x256xf32>
    %177 = arith.addf %174, %176 : vector<16x256xf32>
    %178 = vector.extract_strided_slice %168 {offsets = [0, 1], sizes = [16, 1], strides = [1, 1]} : vector<16x16xf32> to vector<16x1xf32>
    %179 = vector.extract_strided_slice %167 {offsets = [1, 0], sizes = [1, 256], strides = [1, 1]} : vector<8x256xf32> to vector<1x256xf32>
    %180 = vector.broadcast %178 : vector<16x1xf32> to vector<16x256xf32>
    %181 = vector.broadcast %179 : vector<1x256xf32> to vector<16x256xf32>
    %182 = arith.mulf %180, %181 : vector<16x256xf32>
    %183 = arith.maximumf %174, %182 : vector<16x256xf32>
    %184 = vector.extract_strided_slice %168 {offsets = [0, 9], sizes = [16, 1], strides = [1, 1]} : vector<16x16xf32> to vector<16x1xf32>
    %185 = vector.broadcast %184 : vector<16x1xf32> to vector<16x256xf32>
    %186 = arith.addf %182, %185 : vector<16x256xf32>
    %187 = arith.minimumf %177, %186 : vector<16x256xf32>
    %188 = vector.extract_strided_slice %168 {offsets = [0, 2], sizes = [16, 1], strides = [1, 1]} : vector<16x16xf32> to vector<16x1xf32>
    %189 = vector.extract_strided_slice %167 {offsets = [2, 0], sizes = [1, 256], strides = [1, 1]} : vector<8x256xf32> to vector<1x256xf32>
    %190 = vector.broadcast %188 : vector<16x1xf32> to vector<16x256xf32>
    %191 = vector.broadcast %189 : vector<1x256xf32> to vector<16x256xf32>
    %192 = arith.mulf %190, %191 : vector<16x256xf32>
    %193 = arith.maximumf %183, %192 : vector<16x256xf32>
    %194 = vector.extract_strided_slice %168 {offsets = [0, 10], sizes = [16, 1], strides = [1, 1]} : vector<16x16xf32> to vector<16x1xf32>
    %195 = vector.broadcast %194 : vector<16x1xf32> to vector<16x256xf32>
    %196 = arith.addf %192, %195 : vector<16x256xf32>
    %197 = arith.minimumf %187, %196 : vector<16x256xf32>
    %198 = vector.extract_strided_slice %168 {offsets = [0, 3], sizes = [16, 1], strides = [1, 1]} : vector<16x16xf32> to vector<16x1xf32>
    %199 = vector.extract_strided_slice %167 {offsets = [3, 0], sizes = [1, 256], strides = [1, 1]} : vector<8x256xf32> to vector<1x256xf32>
    %200 = vector.broadcast %198 : vector<16x1xf32> to vector<16x256xf32>
    %201 = vector.broadcast %199 : vector<1x256xf32> to vector<16x256xf32>
    %202 = arith.mulf %200, %201 : vector<16x256xf32>
    %203 = arith.maximumf %193, %202 : vector<16x256xf32>
    %204 = vector.extract_strided_slice %168 {offsets = [0, 11], sizes = [16, 1], strides = [1, 1]} : vector<16x16xf32> to vector<16x1xf32>
    %205 = vector.broadcast %204 : vector<16x1xf32> to vector<16x256xf32>
    %206 = arith.addf %202, %205 : vector<16x256xf32>
    %207 = arith.minimumf %197, %206 : vector<16x256xf32>
    %208 = vector.extract_strided_slice %168 {offsets = [0, 4], sizes = [16, 1], strides = [1, 1]} : vector<16x16xf32> to vector<16x1xf32>
    %209 = vector.extract_strided_slice %167 {offsets = [4, 0], sizes = [1, 256], strides = [1, 1]} : vector<8x256xf32> to vector<1x256xf32>
    %210 = vector.broadcast %208 : vector<16x1xf32> to vector<16x256xf32>
    %211 = vector.broadcast %209 : vector<1x256xf32> to vector<16x256xf32>
    %212 = arith.mulf %210, %211 : vector<16x256xf32>
    %213 = arith.maximumf %203, %212 : vector<16x256xf32>
    %214 = vector.extract_strided_slice %168 {offsets = [0, 12], sizes = [16, 1], strides = [1, 1]} : vector<16x16xf32> to vector<16x1xf32>
    %215 = vector.broadcast %214 : vector<16x1xf32> to vector<16x256xf32>
    %216 = arith.addf %212, %215 : vector<16x256xf32>
    %217 = arith.minimumf %207, %216 : vector<16x256xf32>
    %218 = vector.extract_strided_slice %168 {offsets = [0, 5], sizes = [16, 1], strides = [1, 1]} : vector<16x16xf32> to vector<16x1xf32>
    %219 = vector.extract_strided_slice %167 {offsets = [5, 0], sizes = [1, 256], strides = [1, 1]} : vector<8x256xf32> to vector<1x256xf32>
    %220 = vector.broadcast %218 : vector<16x1xf32> to vector<16x256xf32>
    %221 = vector.broadcast %219 : vector<1x256xf32> to vector<16x256xf32>
    %222 = arith.mulf %220, %221 : vector<16x256xf32>
    %223 = arith.maximumf %213, %222 : vector<16x256xf32>
    %224 = vector.extract_strided_slice %168 {offsets = [0, 13], sizes = [16, 1], strides = [1, 1]} : vector<16x16xf32> to vector<16x1xf32>
    %225 = vector.broadcast %224 : vector<16x1xf32> to vector<16x256xf32>
    %226 = arith.addf %222, %225 : vector<16x256xf32>
    %227 = arith.minimumf %217, %226 : vector<16x256xf32>
    %228 = vector.extract_strided_slice %168 {offsets = [0, 6], sizes = [16, 1], strides = [1, 1]} : vector<16x16xf32> to vector<16x1xf32>
    %229 = vector.extract_strided_slice %167 {offsets = [6, 0], sizes = [1, 256], strides = [1, 1]} : vector<8x256xf32> to vector<1x256xf32>
    %230 = vector.broadcast %228 : vector<16x1xf32> to vector<16x256xf32>
    %231 = vector.broadcast %229 : vector<1x256xf32> to vector<16x256xf32>
    %232 = arith.mulf %230, %231 : vector<16x256xf32>
    %233 = arith.maximumf %223, %232 : vector<16x256xf32>
    %234 = vector.extract_strided_slice %168 {offsets = [0, 14], sizes = [16, 1], strides = [1, 1]} : vector<16x16xf32> to vector<16x1xf32>
    %235 = vector.broadcast %234 : vector<16x1xf32> to vector<16x256xf32>
    %236 = arith.addf %232, %235 : vector<16x256xf32>
    %237 = arith.minimumf %227, %236 : vector<16x256xf32>
    %238 = vector.extract_strided_slice %168 {offsets = [0, 7], sizes = [16, 1], strides = [1, 1]} : vector<16x16xf32> to vector<16x1xf32>
    %239 = vector.extract_strided_slice %167 {offsets = [7, 0], sizes = [1, 256], strides = [1, 1]} : vector<8x256xf32> to vector<1x256xf32>
    %240 = vector.broadcast %238 : vector<16x1xf32> to vector<16x256xf32>
    %241 = vector.broadcast %239 : vector<1x256xf32> to vector<16x256xf32>
    %242 = arith.mulf %240, %241 : vector<16x256xf32>
    %243 = arith.maximumf %233, %242 : vector<16x256xf32>
    %244 = vector.extract_strided_slice %168 {offsets = [0, 15], sizes = [16, 1], strides = [1, 1]} : vector<16x16xf32> to vector<16x1xf32>
    %245 = vector.broadcast %244 : vector<16x1xf32> to vector<16x256xf32>
    %246 = arith.addf %242, %245 : vector<16x256xf32>
    %247 = arith.minimumf %237, %246 : vector<16x256xf32>
    %248 = vector.extract_strided_slice %169 {offsets = [0, 0], sizes = [16, 1], strides = [1, 1]} : vector<16x2xf32> to vector<16x1xf32>
    %249 = vector.broadcast %248 : vector<16x1xf32> to vector<16x256xf32>
    %250 = arith.mulf %249, %247 : vector<16x256xf32>
    %251 = vector.extract_strided_slice %169 {offsets = [0, 1], sizes = [16, 1], strides = [1, 1]} : vector<16x2xf32> to vector<16x1xf32>
    %252 = vector.broadcast %251 : vector<16x1xf32> to vector<16x256xf32>
    %253 = arith.mulf %252, %243 : vector<16x256xf32>
    %254 = arith.maximumf %250, %253 : vector<16x256xf32>
    %c0_9 = arith.constant 0 : index
    %c0_10 = arith.constant 0 : index
    %255 = vector.load %arg6[%c0_9, %c0_10] : memref<16x256xf32, #tpu.memory_space<vmem>>, vector<16x256xf32>
    tpu.vector_store %arg6[%c0_9, %c0_10], %254 {strides = array<i32>} : memref<16x256xf32, #tpu.memory_space<vmem>>, vector<16x256xf32>,
    return
  }
  func.func @transform_0(%arg0: i32) -> (i32, i32) {
    %c0_i32 = arith.constant 0 : i32
    %c0_i32_0 = arith.constant 0 : i32
    return %c0_i32, %arg0 : i32, i32
  }
  func.func @transform_1(%arg0: i32) -> (i32, i32) {
    %c0_i32 = arith.constant 0 : i32
    %c0_i32_0 = arith.constant 0 : i32
    %c0_i32_1 = arith.constant 0 : i32
    return %c0_i32, %c0_i32_0 : i32, i32
  }
  func.func @transform_2(%arg0: i32) -> (i32, i32) {
    %c0_i32 = arith.constant 0 : i32
    %c0_i32_0 = arith.constant 0 : i32
    %c0_i32_1 = arith.constant 0 : i32
    return %c0_i32, %c0_i32_0 : i32, i32
  }
  func.func @transform_3(%arg0: i32) -> (i32, i32) {
    %c0_i32 = arith.constant 0 : i32
    %c0_i32_0 = arith.constant 0 : i32
    %c0_i32_1 = arith.constant 0 : i32
    return %c0_i32, %c0_i32_0 : i32, i32
  }
  func.func @transform_4(%arg0: i32) -> (i32, i32) {
    %c0_i32 = arith.constant 0 : i32
    %c0_i32_0 = arith.constant 0 : i32
    %c0_i32_1 = arith.constant 0 : i32
    return %c0_i32, %c0_i32_0 : i32, i32
  }
  func.func @transform_5(%arg0: i32) -> (i32, i32) {
    %c0_i32 = arith.constant 0 : i32
    %c0_i32_0 = arith.constant 0 : i32
    return %c0_i32, %arg0 : i32, i32
  }
}

</mosaic_0001>

<bundles_post_ra>
// kernel: tpu_custom_call.1
= control target key start
LH: loop header
LB: loop body
LE: loop exit
PB: predicated region body
PF: predicated region fallthrough
CT: control target
= control target key end

     0   :  { %10 = vsyncpa [#allocation3], 0  ;;  %s1536_s0 = inlined_call_operand.hbm [shape: f32[16,256], index: 0, kind: input, shape index: {}]   ;;  %s1537_s1 = inlined_call_operand.vmem [shape: f32[8,32], index: 1, kind: input, shape index: {}]   ;;  %s1538_s2 = inlined_call_operand.vmem [shape: f32[8,2], index: 2, kind: input, shape index: {}]   ;;  %s1539_s3 = inlined_call_operand.vmem [shape: f32[16,16], index: 3, kind: input, shape index: {}]   ;;  %s1540_s4 = inlined_call_operand.vmem [shape: f32[16,2], index: 4, kind: input, shape index: {}]   ;;  %s1541_s5 = inlined_call_operand.hbm [shape: f32[16,256], index: 5, kind: output, shape index: {}]  }
   0x1   :  { %11 = vsyncpa [#allocation4], 0  ;;  %s953_s18 = smov [#allocation2]   ;;  %s905_s22 = scalar_lea.hbm %s1536_s0, 512 }
   0x2   :  { %s17_s19 = sshll.u32 %s953_s18, 4  ;;  %p906_p0 = scmp.ne.s32.totalorder %s1536_s0, %s905_s22  ;;  %s18_s19 = int_to_ptr.vmem [resolvable:$true] %s17_s19 }
   0x3   :  { %p909_p1 = scmp.lt.u32.totalorder %s905_s22, %s1536_s0 }
   0x5   :  { %p911_p2 = pnand %p909_p1, %p906_p0 }
   0x7   :  { %914 = shalt.err (!%p911_p2)
}
   0x8   :  { %s915_s27 = scalar_lea.vmem %s18_s19, 512  ;;  %p920_p4 = scmp.lt.s32.totalorder %s18_s19, %s18_s19 }
   0x9   :  { %p916_p3 = scmp.ne.s32.totalorder %s18_s19, %s915_s27  ;;  %p921_p5 = scmp.lt.s32.totalorder %s915_s27, %s915_s27 }
   0xb   :  { %p922_p6 = por %p921_p5, %p920_p4 }
   0xd   :  { %p923_p7 = pnand %p922_p6, %p916_p3 }
   0xf   :  { %926 = shalt.err (!%p923_p7)
}
  0x10   :  { %s954_s28 = smov 256   ;;  %s955_s29 = smov 16  }
  0x11   :  { %23 = dma.hbm_to_vmem [thread:$0]  %s1536_s0, 512, %s18_s19, [#allocation3], %s954_s28, %s954_s28, %s955_s29  }
  0x12   :  { %949 = dma.done.wait [#allocation3], 512  }
  0x13   :  { %950 = vsyncadd [#allocation3], 4294966784  ;;  %v1542_v0 = vmov 1   ;;  %v957_v1 = vmov 16   ;;  %v1038_v2 = vld [vmem:[%s1537_s1] sm:$0xff]  ;;  %v958_v3 = vmov 17   ;;  %v46_v37 = vlaneseq }
  0x14   :  { %843 = vset.pattern.permute.xlu1 %v1542_v0  ;;  %842 = vset.pattern.permute.xlu0 %v957_v1  ;;  %v959_v4 = vmov 18   ;;  %v960_v5 = vmov 2   ;;  %v961_v6 = vmov 4   ;;  %v962_v7 = vmov 3   ;;  %v40_v23 = vld [vmem:[%s1538_s2] sm:$0xff]  ;;  %v1080_v25 = vld [vmem:[%s1539_s3 + $0x8] sm:$0xff] }
  0x15   :  { %63 = vperm.xlu1 %843, %v1038_v2   ;;  %57 = vperm.xlu0 %842, %v1038_v2   ;;  %v963_v8 = vmov 21   ;;  %v964_v9 = vmov 19   ;;  %v965_v10 = vmov 7   ;;  %v966_v11 = vmov 20   ;;  %v1090_v28 = vld [vmem:[%s1539_s3] sm:$0xff]  ;;  %v1127_v36 = vld [vmem:[%s1540_s4 + $0x8] sm:$0xff] }
  0x16   :  { %v967_v12 = vmov 24   ;;  %v968_v13 = vmov 5   ;;  %v969_v14 = vmov 10   ;;  %v970_v15 = vmov 6   ;;  %v1142_v40 = vld [vmem:[#allocation2] sm:$0xff]  ;;  %v1144_v41 = vld [vmem:[#allocation2 + $0x8] sm:$0xff] }
  0x17   :  { %v971_v16 = vmov 27   ;;  %v972_v17 = vmov 22   ;;  %v973_v18 = vmov 13   ;;  %v974_v19 = vmov 23  }
  0x18   :  { %v975_v20 = vmov 30   ;;  %v976_v21 = vmov 8   ;;  %v1543_v22 = vmov 0   ;;  %v978_v24 = vmov 9  }
  0x19   :  { %844 = vset.pattern.permute.xlu1 %v958_v3  ;;  %846 = vset.pattern.permute.xlu0 %v959_v4  ;;  %v979_v26 = vmov 25   ;;  %v980_v27 = vmov 26   ;;  %v981_v29 = vmov 11   ;;  %v982_v30 = vmov 12  }
  0x1a   :  { %79 = vperm.xlu1 %844, %v1038_v2   ;;  %103 = vperm.xlu0 %846, %v1038_v2   ;;  %v983_v31 = vmov 28   ;;  %v984_v32 = vmov 29   ;;  %v985_v33 = vmov 14   ;;  %v1544_v34 = vmov 15  }
  0x1b   :  { %v987_v35 = vmov 31   ;;  %v1135_v38 = vshrl.u32 %v46_v37, 7 }
  0x1d   :  { %v1139_v39 = vsub.s32 1, %v1135_v38  ;;  %v1155_v46 = vsub.s32 2, %v1135_v38  ;;  %v1170_v55 = vsub.s32 3, %v1135_v38  ;;  %v1185_v1 = vsub.s32 4, %v1135_v38 }
  0x1e   :  { %845 = vset.pattern.permute.xlu1 %v960_v5  ;;  %849 = vset.pattern.permute.xlu0 %v961_v6 }
  0x1f   :  { %87 = vperm.xlu1 %845, %v1038_v2   ;;  %135 = vperm.xlu0 %849, %v1038_v2   ;;  %v69_v43 = vrot.slane %v1142_v40, %v1139_v39  ;;  %v73_v44 = vrot.slane %v1144_v41, %v1139_v39  ;;  %v93_v53 = vrot.slane %v1142_v40, %v1155_v46 }
  0x20   :  { %v97_v54 = vrot.slane %v1144_v41, %v1155_v46  ;;  %v117_v60 = vrot.slane %v1142_v40, %v1170_v55  ;;  %v121_v61 = vrot.slane %v1144_v41, %v1170_v55 }
  0x23   :  { %847 = vset.pattern.permute.xlu1 %v962_v7  ;;  %852 = vset.pattern.permute.xlu0 %v963_v8  ;;  %v141_v8 = vrot.slane %v1142_v40, %v1185_v1 }
  0x24   :  { %111 = vperm.xlu1 %847, %v1038_v2   ;;  %175 = vperm.xlu0 %852, %v1038_v2  }
  0x28   :  { %848 = vset.pattern.permute.xlu1 %v964_v9  ;;  %855 = vset.pattern.permute.xlu0 %v965_v10 }
  0x29   :  { %127 = vperm.xlu1 %848, %v1038_v2   ;;  %207 = vperm.xlu0 %855, %v1038_v2  }
  0x2d   :  { %850 = vset.pattern.permute.xlu1 %v966_v11  ;;  %858 = vset.pattern.permute.xlu0 %v967_v12  ;;  %v145_v12 = vrot.slane %v1144_v41, %v1185_v1 }
  0x2e   :  { %151 = vperm.xlu1 %850, %v1038_v2   ;;  %247 = vperm.xlu0 %858, %v1038_v2  }
  0x32   :  { %851 = vset.pattern.permute.xlu1 %v968_v13  ;;  %861 = vset.pattern.permute.xlu0 %v969_v14 }
  0x33   :  { %159 = vperm.xlu1 %851, %v1038_v2   ;;  %279 = vperm.xlu0 %861, %v1038_v2  }
  0x37   :  { %853 = vset.pattern.permute.xlu1 %v970_v15  ;;  %864 = vset.pattern.permute.xlu0 %v971_v16 }
  0x38   :  { %183 = vperm.xlu1 %853, %v1038_v2   ;;  %319 = vperm.xlu0 %864, %v1038_v2  }
  0x3c   :  { %854 = vset.pattern.permute.xlu1 %v972_v17  ;;  %867 = vset.pattern.permute.xlu0 %v973_v18 }
  0x3d   :  { %199 = vperm.xlu1 %854, %v1038_v2   ;;  %351 = vperm.xlu0 %867, %v1038_v2  }
  0x41   :  { %856 = vset.pattern.permute.xlu1 %v974_v19  ;;  %870 = vset.pattern.permute.xlu0 %v975_v20 }
  0x42   :  { %223 = vperm.xlu1 %856, %v1038_v2   ;;  %391 = vperm.xlu0 %870, %v1038_v2  }
  0x46   :  { %857 = vset.pattern.permute.xlu1 %v976_v21  ;;  %871 = vset.pattern.permute.xlu0 %v1543_v22 }
  0x47   :  { %231 = vperm.xlu1 %857, %v1038_v2   ;;  %43 = vperm.xlu0 %871, %v1038_v2  }
  0x4b   :  { %859 = vset.pattern.permute.xlu1 %v978_v24  ;;  %424 = vperm.xlu0 %871, %v40_v23  }
  0x4c   :  { %255 = vperm.xlu1 %859, %v1038_v2  }
  0x4f   :  { %448 = vperm.xlu0 %871, %v1080_v25  }
  0x50   :  { %860 = vset.pattern.permute.xlu1 %v979_v26 }
  0x51   :  { %271 = vperm.xlu1 %860, %v1038_v2  }
  0x53   :  { %877 = vset.pattern.permute.xlu0 %v976_v21 }
  0x54   :  { %468 = vperm.xlu0 %877, %v1080_v25  }
  0x55   :  { %862 = vset.pattern.permute.xlu1 %v980_v27  ;;  %v1214_v27 = vld [vmem:[#allocation2 + $0x10] sm:$0xff] }
  0x56   :  { %295 = vperm.xlu1 %862, %v1038_v2  }
  0x58   :  { %879 = vset.pattern.permute.xlu0 %v978_v24 }
  0x59   :  { %500 = vperm.xlu0 %879, %v1090_v28  }
  0x5a   :  { %863 = vset.pattern.permute.xlu1 %v981_v29 }
  0x5b   :  { %303 = vperm.xlu1 %863, %v1038_v2  }
  0x5d   :  { %882 = vset.pattern.permute.xlu0 %v960_v5 }
  0x5e   :  { %520 = vperm.xlu0 %882, %v1080_v25  }
  0x5f   :  { %865 = vset.pattern.permute.xlu1 %v982_v30 }
  0x60   :  { %327 = vperm.xlu1 %865, %v1038_v2  }
  0x62   :  { %884 = vset.pattern.permute.xlu0 %v962_v7 }
  0x63   :  { %556 = vperm.xlu0 %884, %v1090_v28  }
  0x64   :  { %866 = vset.pattern.permute.xlu1 %v983_v31  ;;  %v1216_v31 = vld [vmem:[#allocation2 + $0x18] sm:$0xff] }
  0x65   :  { %343 = vperm.xlu1 %866, %v1038_v2  }
  0x67   :  { %887 = vset.pattern.permute.xlu0 %v981_v29 }
  0x68   :  { %584 = vperm.xlu0 %887, %v1080_v25  }
  0x69   :  { %868 = vset.pattern.permute.xlu1 %v984_v32 }
  0x6a   :  { %367 = vperm.xlu1 %868, %v1038_v2  }
  0x6c   :  { %889 = vset.pattern.permute.xlu0 %v982_v30 }
  0x6d   :  { %620 = vperm.xlu0 %889, %v1090_v28  }
  0x6e   :  { %869 = vset.pattern.permute.xlu1 %v985_v33 }
  0x6f   :  { %375 = vperm.xlu1 %869, %v1038_v2  }
  0x71   :  { %892 = vset.pattern.permute.xlu0 %v968_v13 }
  0x72   :  { %640 = vperm.xlu0 %892, %v1080_v25  }
  0x73   :  { %872 = vset.pattern.permute.xlu1 %v1544_v34 }
  0x74   :  { %399 = vperm.xlu1 %872, %v1038_v2  }
  0x76   :  { %894 = vset.pattern.permute.xlu0 %v970_v15 }
  0x77   :  { %676 = vperm.xlu0 %894, %v1090_v28  }
  0x78   :  { %873 = vset.pattern.permute.xlu1 %v987_v35 }
  0x79   :  { %415 = vperm.xlu1 %873, %v1038_v2  }
  0x7b   :  { %897 = vset.pattern.permute.xlu0 %v985_v33 }
  0x7c   :  { %704 = vperm.xlu0 %897, %v1080_v25  }
  0x7d   :  { %874 = vset.pattern.permute.xlu1 %v1542_v0 }
  0x7e   :  { %430 = vperm.xlu1 %874, %v40_v23  }
  0x80   :  { %899 = vset.pattern.permute.xlu0 %v1544_v34 }
  0x81   :  { %740 = vperm.xlu0 %899, %v1090_v28  }
  0x82   :  { %875 = vset.pattern.permute.xlu1 %v1543_v22 }
  0x83   :  { %443 = vperm.xlu1 %875, %v1090_v28  }
  0x85   :  { %902 = vset.pattern.permute.xlu0 %v1543_v22 }
  0x86   :  { %762 = vperm.xlu0 %902, %v1127_v36  }
  0x87   :  { %876 = vset.pattern.permute.xlu1 %v976_v21 }
  0x88   :  { %464 = vperm.xlu1 %876, %v1090_v28  }
  0x8a   :  { %904 = vset.pattern.permute.xlu0 %v1542_v0 }
  0x8c   :  { %878 = vset.pattern.permute.xlu1 %v1542_v0 }
  0x8d   :  { %476 = vperm.xlu1 %878, %v1090_v28  }
  0x91   :  { %480 = vperm.xlu1 %878, %v1080_v25  }
  0x94   :  { %v64_v42 = vpop.permute.xlu1 %63  ;;  %v1150_v45 = vpop.permute.xlu0 %57 }
  0x95   :  { %880 = vset.pattern.permute.xlu1 %v978_v24  ;;  %v74_v47 = vmul.f32 %v69_v43, %v64_v42  ;;  %v75_v48 = vmul.f32 %v73_v44, %v64_v42 }
  0x96   :  { %504 = vperm.xlu1 %880, %v1080_v25  }
  0x99   :  { %v80_v49 = vpop.permute.xlu1 %79  ;;  %v1157_v50 = vpop.permute.xlu0 %103 }
  0x9a   :  { %v1159_v51 = vadd.f32 %v80_v49, %v74_v47  ;;  %v1161_v52 = vadd.f32 %v80_v49, %v75_v48  ;;  %881 = vset.pattern.permute.xlu1 %v960_v5  ;;  %v289_v49 = vrot.slane %v1216_v31, %v1155_v46 }
  0x9b   :  { %516 = vperm.xlu1 %881, %v1090_v28  }
  0x9e   :  { %v88_v56 = vpop.permute.xlu1 %87  ;;  %v136_v57 = vpop.permute.xlu0 %135 }
  0x9f   :  { %v1172_v58 = vmul.f32 %v93_v53, %v88_v56  ;;  %v1174_v59 = vmul.f32 %v97_v54, %v88_v56  ;;  %883 = vset.pattern.permute.xlu1 %v969_v14  ;;  %v1195_v14 = vsub.s32 7, %v1135_v38  ;;  %v1203_v21 = vmul.f32 %v141_v8, %v136_v57 }
  0xa0   :  { %540 = vperm.xlu1 %883, %v1090_v28   ;;  %v1205_v23 = vmul.f32 %v145_v12, %v136_v57  ;;  %v1239_v53 = vsub.s32 6, %v1135_v38 }
  0xa1   :  { %v76_v62 = vmax.f32 %v1172_v58, %v74_v47  ;;  %v77_v63 = vmax.f32 %v1174_v59, %v75_v48  ;;  %v213_v24 = vrot.slane %v1142_v40, %v1195_v14  ;;  %v217_v26 = vrot.slane %v1144_v41, %v1195_v14 }
  0xa2   :  { %v285_v48 = vrot.slane %v1214_v27, %v1155_v46 }
  0xa3   :  { %v112_v2 = vpop.permute.xlu1 %111  ;;  %v1187_v3 = vpop.permute.xlu0 %175 }
  0xa4   :  { %v122_v4 = vmul.f32 %v117_v60, %v112_v2  ;;  %v123_v5 = vmul.f32 %v121_v61, %v112_v2  ;;  %544 = vperm.xlu1 %883, %v1080_v25  }
  0xa6   :  { %v100_v9 = vmax.f32 %v76_v62, %v122_v4  ;;  %v101_v11 = vmax.f32 %v77_v63, %v123_v5 }
  0xa8   :  { %885 = vset.pattern.permute.xlu1 %v962_v7  ;;  %v128_v16 = vpop.permute.xlu1 %127  ;;  %v208_v20 = vpop.permute.xlu0 %207  ;;  %v1212_v7 = vsub.s32 5, %v1135_v38  ;;  %v124_v37 = vmax.f32 %v100_v9, %v1203_v21  ;;  %v125_v42 = vmax.f32 %v101_v11, %v1205_v23 }
  0xa9   :  { %v1198_v17 = vadd.f32 %v128_v16, %v122_v4  ;;  %v1200_v19 = vadd.f32 %v128_v16, %v123_v5  ;;  %560 = vperm.xlu1 %885, %v1080_v25   ;;  %v1226_v43 = vmul.f32 %v213_v24, %v208_v20  ;;  %v1228_v44 = vmul.f32 %v217_v26, %v208_v20 }
  0xaa   :  { %v165_v47 = vrot.slane %v1142_v40, %v1212_v7  ;;  %v189_v4 = vrot.slane %v1142_v40, %v1239_v53  ;;  %v193_v5 = vrot.slane %v1144_v41, %v1239_v53 }
  0xab   :  { %v148_v54 = vmax.f32 %v124_v37, %v1226_v43  ;;  %v149_v56 = vmax.f32 %v125_v42, %v1228_v44 }
  0xad   :  { %886 = vset.pattern.permute.xlu1 %v981_v29  ;;  %v1219_v32 = vpop.permute.xlu1 %151  ;;  %v1221_v35 = vpop.permute.xlu0 %247  ;;  %v169_v29 = vrot.slane %v1144_v41, %v1212_v7 }
  0xae   :  { %580 = vperm.xlu1 %886, %v1090_v28  }
  0xb2   :  { %888 = vset.pattern.permute.xlu1 %v961_v6  ;;  %v160_v57 = vpop.permute.xlu1 %159  ;;  %v280_v60 = vpop.permute.xlu0 %279 }
  0xb3   :  { %v1244_v61 = vmul.f32 %v165_v47, %v160_v57  ;;  %v1246_v62 = vmul.f32 %v169_v29, %v160_v57  ;;  %596 = vperm.xlu1 %888, %v1090_v28   ;;  %v1249_v63 = vmul.f32 %v285_v48, %v280_v60  ;;  %v1251_v2 = vmul.f32 %v289_v49, %v280_v60 }
  0xb4   :  { %v357_v49 = vrot.slane %v1214_v27, %v1212_v7 }
  0xb5   :  { %v172_v6 = vmax.f32 %v148_v54, %v1244_v61  ;;  %v173_v8 = vmax.f32 %v149_v56, %v1246_v62  ;;  %v361_v54 = vrot.slane %v1216_v31, %v1212_v7  ;;  %v1275_v56 = vsub.s32 0, %v1135_v38 }
  0xb7   :  { %v196_v9 = vmax.f32 %v172_v6, %v1249_v63  ;;  %v197_v11 = vmax.f32 %v173_v8, %v1251_v2  ;;  %600 = vperm.xlu1 %888, %v1080_v25   ;;  %v184_v12 = vpop.permute.xlu1 %183  ;;  %v1262_v16 = vpop.permute.xlu0 %319  ;;  %v241_v6 = vrot.slane %v1216_v31, %v1275_v56  ;;  %v49_v38 = vrot.slane %v1142_v40, %v1275_v56 }
  0xb8   :  { %v194_v20 = vmul.f32 %v189_v4, %v184_v12  ;;  %v195_v24 = vmul.f32 %v193_v5, %v184_v12  ;;  %v237_v5 = vrot.slane %v1214_v27, %v1275_v56  ;;  %v261_v40 = vrot.slane %v1214_v27, %v1139_v39 }
  0xba   :  { %v220_v26 = vmax.f32 %v196_v9, %v194_v20  ;;  %v221_v37 = vmax.f32 %v197_v11, %v195_v24 }
  0xbb   :  { %890 = vset.pattern.permute.xlu1 %v982_v30 }
  0xbc   :  { %624 = vperm.xlu1 %890, %v1080_v25   ;;  %v200_v42 = vpop.permute.xlu1 %199  ;;  %v352_v48 = vpop.permute.xlu0 %351 }
  0xbd   :  { %v1266_v47 = vadd.f32 %v200_v42, %v194_v20  ;;  %v1268_v29 = vadd.f32 %v200_v42, %v195_v24  ;;  %v1281_v60 = vmul.f32 %v357_v49, %v352_v48  ;;  %v1283_v4 = vmul.f32 %v361_v54, %v352_v48 }
  0xbe   :  { %v106_v54 = vadd.f32 %v1157_v50, %v1172_v58  ;;  %v155_v58 = vadd.f32 %v1219_v32, %v1205_v23 }
  0xbf   :  { %v244_v8 = vmax.f32 %v220_v26, %v1281_v60  ;;  %v245_v9 = vmax.f32 %v221_v37, %v1283_v4 }
  0xc0   :  { %891 = vset.pattern.permute.xlu1 %v968_v13  ;;  %v53_v13 = vrot.slane %v1144_v41, %v1275_v56  ;;  %v265_v41 = vrot.slane %v1216_v31, %v1139_v39 }
  0xc1   :  { %636 = vperm.xlu1 %891, %v1090_v28   ;;  %v224_v30 = vpop.permute.xlu1 %223  ;;  %v1279_v57 = vpop.permute.xlu0 %391 }
  0xc5   :  { %893 = vset.pattern.permute.xlu1 %v973_v18 }
  0xc6   :  { %660 = vperm.xlu1 %893, %v1090_v28   ;;  %v232_v11 = vpop.permute.xlu1 %231  ;;  %v44_v12 = vpop.permute.xlu0 %43 }
  0xc7   :  { %v242_v20 = vmul.f32 %v237_v5, %v232_v11  ;;  %v243_v24 = vmul.f32 %v241_v6, %v232_v11  ;;  %v54_v42 = vmul.f32 %v49_v38, %v44_v12  ;;  %v55_v48 = vmul.f32 %v53_v13, %v44_v12 }
  0xc8   :  { %v107_v5 = vadd.f32 %v1157_v50, %v1174_v59  ;;  %v154_v50 = vadd.f32 %v1219_v32, %v1203_v21  ;;  %v313_v32 = vrot.slane %v1216_v31, %v1170_v55 }
  0xc9   :  { %v268_v49 = vmax.f32 %v244_v8, %v242_v20  ;;  %v269_v18 = vmax.f32 %v245_v9, %v243_v24  ;;  %v60_v26 = vadd.f32 %v1150_v45, %v54_v42  ;;  %v61_v37 = vadd.f32 %v1150_v45, %v55_v48 }
  0xca   :  { %664 = vperm.xlu1 %893, %v1080_v25  }
  0xcb   :  { %v292_v6 = vmax.f32 %v268_v49, %v54_v42  ;;  %v293_v38 = vmax.f32 %v269_v18, %v55_v48  ;;  %v256_v13 = vpop.permute.xlu1 %255  ;;  %v84_v11 = vmin.f32 %v60_v26, %v1159_v51  ;;  %v85_v8 = vmin.f32 %v61_v37, %v1161_v52 }
  0xcc   :  { %v266_v9 = vmul.f32 %v261_v40, %v256_v13  ;;  %v267_v12 = vmul.f32 %v265_v41, %v256_v13  ;;  %v178_v40 = vadd.f32 %v1187_v3, %v1244_v61  ;;  %v251_v61 = vadd.f32 %v1221_v35, %v243_v24 }
  0xcd   :  { %v108_v0 = vmin.f32 %v84_v11, %v106_v54  ;;  %v109_v22 = vmin.f32 %v85_v8, %v107_v5  ;;  %v333_v37 = vrot.slane %v1214_v27, %v1185_v1  ;;  %v337_v54 = vrot.slane %v1216_v31, %v1185_v1 }
  0xce   :  { %v316_v45 = vmax.f32 %v292_v6, %v266_v9  ;;  %v317_v34 = vmax.f32 %v293_v38, %v267_v12  ;;  %895 = vset.pattern.permute.xlu1 %v970_v15  ;;  %v179_v15 = vadd.f32 %v1187_v3, %v1246_v62  ;;  %v309_v3 = vrot.slane %v1214_v27, %v1170_v55 }
  0xcf   :  { %680 = vperm.xlu1 %895, %v1080_v25   ;;  %v132_v51 = vmin.f32 %v108_v0, %v1198_v17  ;;  %v133_v52 = vmin.f32 %v109_v22, %v1200_v19  ;;  %v226_v22 = vadd.f32 %v224_v30, %v1226_v43  ;;  %v227_v17 = vadd.f32 %v224_v30, %v1228_v44 }
  0xd0   :  { %v272_v59 = vpop.permute.xlu1 %271 }
  0xd1   :  { %v274_v42 = vadd.f32 %v272_v59, %v266_v9  ;;  %v275_v48 = vadd.f32 %v272_v59, %v267_v12  ;;  %v156_v41 = vmin.f32 %v132_v51, %v154_v50  ;;  %v157_v49 = vmin.f32 %v133_v52, %v155_v58 }
  0xd2   :  { %v1545_v51 = vmov 15   ;;  %v1546_v59 = vmov 0  }
  0xd3   :  { %896 = vset.pattern.permute.xlu1 %v985_v33  ;;  %v180_v21 = vmin.f32 %v156_v41, %v178_v40  ;;  %v181_v18 = vmin.f32 %v157_v49, %v179_v15  ;;  %v250_v33 = vadd.f32 %v1221_v35, %v242_v20  ;;  %v1547_v49 = vmov 1  }
  0xd4   :  { %700 = vperm.xlu1 %896, %v1090_v28  }
  0xd5   :  { %v296_v0 = vpop.permute.xlu1 %295  ;;  %v204_v19 = vmin.f32 %v180_v21, %v1266_v47  ;;  %v205_v23 = vmin.f32 %v181_v18, %v1268_v29  ;;  %v385_v21 = vrot.slane %v1216_v31, %v1239_v53 }
  0xd6   :  { %v298_v35 = vadd.f32 %v296_v0, %v1249_v63  ;;  %v299_v24 = vadd.f32 %v296_v0, %v1251_v2  ;;  %v439_v2 = vld [vmem:[%s1540_s4] sm:$0xff]  ;;  %s988_s4 = smov [#allocation5]  }
  0xd7   :  { %v228_v62 = vmin.f32 %v204_v19, %v226_v22  ;;  %v229_v26 = vmin.f32 %v205_v23, %v227_v17  ;;  %s794_s15 = sshll.u32 %s988_s4, 4  ;;  %s795_s15 = int_to_ptr.vmem [resolvable:$true] %s794_s15 }
  0xd8   :  { %898 = vset.pattern.permute.xlu1 %v965_v10  ;;  %s927_s16 = scalar_lea.vmem %s795_s15, 512  ;;  %p932_p9 = scmp.lt.s32.totalorder %s795_s15, %s795_s15 }
  0xd9   :  { %716 = vperm.xlu1 %898, %v1090_v28   ;;  %v252_v43 = vmin.f32 %v228_v62, %v250_v33  ;;  %v253_v44 = vmin.f32 %v229_v26, %v251_v61  ;;  %p928_p8 = scmp.ne.s32.totalorder %s795_s15, %s927_s16  ;;  %p933_p10 = scmp.lt.s32.totalorder %s927_s16, %s927_s16 }
  0xda   :  { %v304_v47 = vpop.permute.xlu1 %303 }
  0xdb   :  { %v314_v29 = vmul.f32 %v309_v3, %v304_v47  ;;  %v315_v30 = vmul.f32 %v313_v32, %v304_v47  ;;  %v276_v20 = vmin.f32 %v252_v43, %v274_v42  ;;  %v277_v5 = vmin.f32 %v253_v44, %v275_v48  ;;  %p934_p11 = por %p933_p10, %p932_p9 }
  0xdd   :  { %v340_v10 = vmax.f32 %v316_v45, %v314_v29  ;;  %v341_v6 = vmax.f32 %v317_v34, %v315_v30  ;;  %v322_v28 = vadd.f32 %v1262_v16, %v314_v29  ;;  %v323_v38 = vadd.f32 %v1262_v16, %v315_v30  ;;  %720 = vperm.xlu1 %898, %v1080_v25   ;;  %p935_p12 = pnand %p934_p11, %p928_p8 }
  0xde   :  { %v300_v13 = vmin.f32 %v276_v20, %v298_v35  ;;  %v301_v11 = vmin.f32 %v277_v5, %v299_v24  ;;  %v425_v20 = vpop.permute.xlu0 %424 }
  0xdf   :  { %v328_v8 = vpop.permute.xlu1 %327 }
  0xe0   :  { %v338_v9 = vmul.f32 %v333_v37, %v328_v8  ;;  %v339_v12 = vmul.f32 %v337_v54, %v328_v8  ;;  %v324_v50 = vmin.f32 %v300_v13, %v322_v28  ;;  %v325_v58 = vmin.f32 %v301_v11, %v323_v38 }
  0xe1   :  { %900 = vset.pattern.permute.xlu1 %v1545_v51 }
  0xe2   :  { %v364_v63 = vmax.f32 %v340_v10, %v338_v9  ;;  %v365_v52 = vmax.f32 %v341_v6, %v339_v12  ;;  %744 = vperm.xlu1 %900, %v1080_v25   ;;  %v381_v25 = vrot.slane %v1214_v27, %v1239_v53  ;;  %v1369_v28 = vpop.permute.xlu0 %448 }
  0xe4   :  { %v344_v34 = vpop.permute.xlu1 %343 }
  0xe5   :  { %v346_v16 = vadd.f32 %v344_v34, %v338_v9  ;;  %v347_v45 = vadd.f32 %v344_v34, %v339_v12 }
  0xe6   :  { %901 = vset.pattern.permute.xlu1 %v1546_v59 }
  0xe7   :  { %v348_v42 = vmin.f32 %v324_v50, %v346_v16  ;;  %v349_v48 = vmin.f32 %v325_v58, %v347_v45  ;;  %757 = vperm.xlu1 %901, %v439_v2   ;;  %v1381_v50 = vpop.permute.xlu0 %468 }
  0xe9   :  { %v368_v40 = vpop.permute.xlu1 %367 }
  0xea   :  { %v370_v15 = vadd.f32 %v368_v40, %v1281_v60  ;;  %v371_v41 = vadd.f32 %v368_v40, %v1283_v4  ;;  %v405_v60 = vrot.slane %v1214_v27, %v1195_v14  ;;  %v409_v4 = vrot.slane %v1216_v31, %v1195_v14 }
  0xeb   :  { %903 = vset.pattern.permute.xlu1 %v1547_v49  ;;  %v501_v16 = vpop.permute.xlu0 %500 }
  0xec   :  { %v372_v18 = vmin.f32 %v348_v42, %v370_v15  ;;  %v373_v0 = vmin.f32 %v349_v48, %v371_v41  ;;  %770 = vperm.xlu1 %903, %v439_v2  }
  0xee   :  { %v376_v22 = vpop.permute.xlu1 %375 }
  0xef   :  { %v386_v17 = vmul.f32 %v381_v25, %v376_v22  ;;  %v387_v19 = vmul.f32 %v385_v21, %v376_v22  ;;  %v1397_v25 = vpop.permute.xlu0 %520 }
  0xf0   :  { %774 = vperm.xlu1 %903, %v1127_v36  }
  0xf1   :  { %v388_v23 = vmax.f32 %v364_v63, %v386_v17  ;;  %v389_v3 = vmax.f32 %v365_v52, %v387_v19  ;;  %v394_v32 = vadd.f32 %v1279_v57, %v386_v17  ;;  %v395_v33 = vadd.f32 %v1279_v57, %v387_v19 }
  0xf3   :  { %v400_v61 = vpop.permute.xlu1 %399  ;;  %v396_v62 = vmin.f32 %v372_v18, %v394_v32  ;;  %v397_v26 = vmin.f32 %v373_v0, %v395_v33 }
  0xf4   :  { %v410_v43 = vmul.f32 %v405_v60, %v400_v61  ;;  %v411_v44 = vmul.f32 %v409_v4, %v400_v61  ;;  %v557_v60 = vpop.permute.xlu0 %556 }
  0xf6   :  { %v412_v47 = vmax.f32 %v388_v23, %v410_v43  ;;  %v413_v29 = vmax.f32 %v389_v3, %v411_v44 }
  0xf8   :  { %v416_v36 = vpop.permute.xlu1 %415 }
  0xf9   :  { %v418_v30 = vadd.f32 %v416_v36, %v410_v43  ;;  %v419_v37 = vadd.f32 %v416_v36, %v411_v44  ;;  %v1423_v36 = vpop.permute.xlu0 %584 }
  0xfb   :  { %v420_v27 = vmin.f32 %v396_v62, %v418_v30  ;;  %v421_v54 = vmin.f32 %v397_v26, %v419_v37 }
  0xfd   :  { %v427_v31 = vmul.f32 %v425_v20, %v420_v27  ;;  %v428_v5 = vmul.f32 %v425_v20, %v421_v54  ;;  %v431_v35 = vpop.permute.xlu1 %430 }
  0xfe   :  { %v433_v24 = vmul.f32 %v431_v35, %v412_v47  ;;  %v434_v10 = vmul.f32 %v431_v35, %v413_v29 }
 0x100   :  { %v1365_v6 = vmax.f32 %v427_v31, %v433_v24  ;;  %v1367_v57 = vmax.f32 %v428_v5, %v434_v10  ;;  %v621_v10 = vpop.permute.xlu0 %620 }
 0x102   :  { %v444_v38 = vpop.permute.xlu1 %443  ;;  %v1373_v13 = vrot.slane %v1365_v6, %v1275_v56  ;;  %v1377_v11 = vrot.slane %v1367_v57, %v1275_v56  ;;  %v1385_v63 = vrot.slane %v1365_v6, %v1139_v39  ;;  %v1389_v52 = vrot.slane %v1367_v57, %v1139_v39 }
 0x103   :  { %v1401_v39 = vrot.slane %v1365_v6, %v1155_v46  ;;  %v1405_v21 = vrot.slane %v1367_v57, %v1155_v46  ;;  %v1409_v18 = vrot.slane %v1365_v6, %v1170_v55  ;;  %v1413_v0 = vrot.slane %v1367_v57, %v1170_v55 }
 0x104   :  { %v459_v8 = vmul.f32 %v1373_v13, %v444_v38  ;;  %v460_v9 = vmul.f32 %v1377_v11, %v444_v38  ;;  %v1427_v20 = vrot.slane %v1365_v6, %v1185_v1  ;;  %v1431_v31 = vrot.slane %v1367_v57, %v1185_v1 }
 0x105   :  { %v571_v3 = vmul.f32 %v1409_v18, %v557_v60  ;;  %v572_v46 = vmul.f32 %v1413_v0, %v557_v60  ;;  %v1443_v1 = vrot.slane %v1365_v6, %v1212_v7 }
 0x107   :  { %v465_v12 = vpop.permute.xlu1 %464 }
 0x108   :  { %v471_v58 = vadd.f32 %v465_v12, %v459_v8  ;;  %v472_v51 = vadd.f32 %v465_v12, %v460_v9 }
 0x10c   :  { %v477_v34 = vpop.permute.xlu1 %476 }
 0x10d   :  { %v491_v56 = vmul.f32 %v1385_v63, %v477_v34  ;;  %v492_v2 = vmul.f32 %v1389_v52, %v477_v34 }
 0x10f   :  { %v495_v45 = vmax.f32 %v459_v8, %v491_v56  ;;  %v496_v59 = vmax.f32 %v460_v9, %v492_v2  ;;  %v507_v42 = vadd.f32 %v501_v16, %v491_v56  ;;  %v508_v48 = vadd.f32 %v501_v16, %v492_v2  ;;  %v1437_v56 = vpop.permute.xlu0 %640 }
 0x110   :  { %v1393_v40 = vpop.permute.xlu1 %480  ;;  %v1447_v16 = vrot.slane %v1367_v57, %v1212_v7 }
 0x111   :  { %v511_v15 = vmin.f32 %v471_v58, %v507_v42  ;;  %v512_v41 = vmin.f32 %v472_v51, %v508_v48 }
 0x113   :  { %v677_v42 = vpop.permute.xlu0 %676 }
 0x115   :  { %v1395_v49 = vpop.permute.xlu1 %504 }
 0x11a   :  { %v517_v22 = vpop.permute.xlu1 %516 }
 0x11b   :  { %v531_v17 = vmul.f32 %v1401_v39, %v517_v22  ;;  %v532_v19 = vmul.f32 %v1405_v21, %v517_v22 }
 0x11d   :  { %v535_v4 = vmax.f32 %v495_v45, %v531_v17  ;;  %v536_v23 = vmax.f32 %v496_v59, %v532_v19  ;;  %v1451_v45 = vrot.slane %v1365_v6, %v1239_v53  ;;  %v1455_v59 = vrot.slane %v1367_v57, %v1239_v53 }
 0x11f   :  { %v541_v32 = vpop.permute.xlu1 %540  ;;  %v575_v33 = vmax.f32 %v535_v4, %v571_v3  ;;  %v576_v61 = vmax.f32 %v536_v23, %v572_v46  ;;  %v691_v22 = vmul.f32 %v1451_v45, %v677_v42 }
 0x120   :  { %v547_v62 = vadd.f32 %v541_v32, %v531_v17  ;;  %v548_v26 = vadd.f32 %v541_v32, %v532_v19  ;;  %v692_v17 = vmul.f32 %v1455_v59, %v677_v42 }
 0x122   :  { %v551_v43 = vmin.f32 %v511_v15, %v547_v62  ;;  %v552_v55 = vmin.f32 %v512_v41, %v548_v26  ;;  %v461_v26 = vmul.f32 %v1373_v13, %v1369_v28  ;;  %v730_v13 = vrot.slane %v1367_v57, %v1195_v14 }
 0x123   :  { %v1419_v44 = vpop.permute.xlu1 %544 }
 0x128   :  { %v1421_v47 = vpop.permute.xlu1 %560 }
 0x12d   :  { %v581_v29 = vpop.permute.xlu1 %580 }
 0x12e   :  { %v587_v30 = vadd.f32 %v581_v29, %v571_v3  ;;  %v588_v37 = vadd.f32 %v581_v29, %v572_v46 }
 0x130   :  { %v591_v27 = vmin.f32 %v551_v43, %v587_v30  ;;  %v592_v54 = vmin.f32 %v552_v55, %v588_v37  ;;  %v462_v43 = vmul.f32 %v1377_v11, %v1369_v28  ;;  %v705_v55 = vpop.permute.xlu0 %704  ;;  %v493_v37 = vmul.f32 %v1385_v63, %v1393_v40 }
 0x131   :  { %v473_v28 = vadd.f32 %v1381_v50, %v461_v26  ;;  %v533_v63 = vmul.f32 %v1401_v39, %v1397_v25  ;;  %v574_v39 = vmul.f32 %v1413_v0, %v1421_v47 }
 0x132   :  { %v597_v5 = vpop.permute.xlu1 %596  ;;  %v474_v11 = vadd.f32 %v1381_v50, %v462_v43  ;;  %v573_v50 = vmul.f32 %v1409_v18, %v1421_v47 }
 0x133   :  { %v611_v35 = vmul.f32 %v1427_v20, %v597_v5  ;;  %v612_v24 = vmul.f32 %v1431_v31, %v597_v5 }
 0x134   :  { %v589_v47 = vadd.f32 %v1423_v36, %v573_v50 }
 0x135   :  { %v615_v38 = vmax.f32 %v575_v33, %v611_v35  ;;  %v616_v8 = vmax.f32 %v576_v61, %v612_v24  ;;  %v627_v9 = vadd.f32 %v621_v10, %v611_v35  ;;  %v628_v12 = vadd.f32 %v621_v10, %v612_v24  ;;  %v741_v24 = vpop.permute.xlu0 %740 }
 0x136   :  { %v1435_v58 = vpop.permute.xlu1 %600  ;;  %v726_v35 = vrot.slane %v1365_v6, %v1195_v14  ;;  %v509_v10 = vadd.f32 %v1395_v49, %v493_v37  ;;  %v497_v14 = vmax.f32 %v461_v26, %v493_v37 }
 0x137   :  { %v631_v51 = vmin.f32 %v591_v27, %v627_v9  ;;  %v632_v34 = vmin.f32 %v592_v54, %v628_v12  ;;  %v494_v27 = vmul.f32 %v1389_v52, %v1393_v40  ;;  %v534_v52 = vmul.f32 %v1405_v21, %v1397_v25 }
 0x138   :  { %v549_v12 = vadd.f32 %v1419_v44, %v533_v63  ;;  %v513_v42 = vmin.f32 %v473_v28, %v509_v10 }
 0x139   :  { %v498_v57 = vmax.f32 %v462_v43, %v494_v27 }
 0x13b   :  { %v1439_v2 = vpop.permute.xlu1 %624 }
 0x140   :  { %v637_v48 = vpop.permute.xlu1 %636 }
 0x141   :  { %v651_v15 = vmul.f32 %v1443_v1, %v637_v48  ;;  %v652_v41 = vmul.f32 %v1447_v16, %v637_v48 }
 0x143   :  { %v655_v7 = vmax.f32 %v615_v38, %v651_v15  ;;  %v656_v19 = vmax.f32 %v616_v8, %v652_v41  ;;  %v510_v38 = vadd.f32 %v1395_v49, %v494_v27 }
 0x145   :  { %v661_v60 = vpop.permute.xlu1 %660  ;;  %v1461_v4 = vmax.f32 %v655_v7, %v691_v22  ;;  %v1463_v23 = vmax.f32 %v656_v19, %v692_v17  ;;  %v514_v18 = vmin.f32 %v474_v11, %v510_v38  ;;  %v538_v7 = vmax.f32 %v498_v57, %v534_v52 }
 0x146   :  { %v667_v3 = vadd.f32 %v661_v60, %v651_v15  ;;  %v668_v53 = vadd.f32 %v661_v60, %v652_v41  ;;  %v590_v15 = vadd.f32 %v1423_v36, %v574_v39  ;;  %v613_v41 = vmul.f32 %v1427_v20, %v1435_v58 }
 0x147   :  { %v654_v36 = vmul.f32 %v1447_v16, %v1437_v56 }
 0x148   :  { %v671_v46 = vmin.f32 %v631_v51, %v667_v3  ;;  %v672_v32 = vmin.f32 %v632_v34, %v668_v53  ;;  %v550_v51 = vadd.f32 %v1419_v44, %v534_v52  ;;  %v553_v44 = vmin.f32 %v513_v42, %v549_v12 }
 0x149   :  { %v665_v33 = vpop.permute.xlu1 %664  ;;  %v629_v60 = vadd.f32 %v1439_v2, %v613_v41 }
 0x14a   :  { %v554_v19 = vmin.f32 %v514_v18, %v550_v51  ;;  %v670_v26 = vadd.f32 %v665_v33, %v654_v36 }
 0x14e   :  { %v681_v61 = vpop.permute.xlu1 %680 }
 0x14f   :  { %v693_v3 = vmul.f32 %v1451_v45, %v681_v61  ;;  %v694_v20 = vmul.f32 %v1455_v59, %v681_v61 }
 0x151   :  { %v709_v37 = vadd.f32 %v705_v55, %v693_v3 }
 0x153   :  { %v701_v62 = vpop.permute.xlu1 %700 }
 0x154   :  { %v707_v29 = vadd.f32 %v701_v62, %v691_v22  ;;  %v708_v30 = vadd.f32 %v701_v62, %v692_v17  ;;  %v614_v22 = vmul.f32 %v1431_v31, %v1435_v58  ;;  %v537_v17 = vmax.f32 %v497_v14, %v533_v63 }
 0x155   :  { %v578_v58 = vmax.f32 %v538_v7, %v574_v39 }
 0x156   :  { %v1473_v54 = vmin.f32 %v671_v46, %v707_v29  ;;  %v1475_v5 = vmin.f32 %v672_v32, %v708_v30  ;;  %v577_v31 = vmax.f32 %v537_v17, %v573_v50  ;;  %v593_v46 = vmin.f32 %v553_v44, %v589_v47 }
 0x157   :  { %v594_v32 = vmin.f32 %v554_v19, %v590_v15  ;;  %v618_v29 = vmax.f32 %v578_v58, %v614_v22 }
 0x158   :  { %v717_v40 = vpop.permute.xlu1 %716  ;;  %v617_v43 = vmax.f32 %v577_v31, %v613_v41 }
 0x159   :  { %v1489_v6 = vmul.f32 %v726_v35, %v717_v40  ;;  %v1491_v8 = vmul.f32 %v730_v13, %v717_v40  ;;  %v658_v28 = vmax.f32 %v618_v29, %v654_v36 }
 0x15b   :  { %v747_v25 = vadd.f32 %v741_v24, %v1489_v6  ;;  %v748_v21 = vadd.f32 %v741_v24, %v1491_v8  ;;  %v735_v9 = vmax.f32 %v1461_v4, %v1489_v6  ;;  %v736_v49 = vmax.f32 %v1463_v23, %v1491_v8 }
 0x15c   :  { %v721_v34 = vpop.permute.xlu1 %720  ;;  %v630_v4 = vadd.f32 %v1439_v2, %v614_v22  ;;  %v653_v23 = vmul.f32 %v1443_v1, %v1437_v56  ;;  %v633_v2 = vmin.f32 %v593_v46, %v629_v60  ;;  %v710_v1 = vadd.f32 %v705_v55, %v694_v20 }
 0x15d   :  { %v751_v48 = vmin.f32 %v1473_v54, %v747_v25  ;;  %v752_v0 = vmin.f32 %v1475_v5, %v748_v21  ;;  %v733_v27 = vmul.f32 %v726_v35, %v721_v34  ;;  %v734_v54 = vmul.f32 %v730_v13, %v721_v34  ;;  %v763_v35 = vpop.permute.xlu0 %762 }
 0x15e   :  { %v669_v62 = vadd.f32 %v665_v33, %v653_v23  ;;  %v634_v30 = vmin.f32 %v594_v32, %v630_v4  ;;  %v657_v61 = vmax.f32 %v617_v43, %v653_v23  ;;  %v698_v40 = vmax.f32 %v658_v28, %v694_v20 }
 0x160   :  { %v673_v16 = vmin.f32 %v633_v2, %v669_v62  ;;  %v674_v45 = vmin.f32 %v634_v30, %v670_v26  ;;  %v697_v52 = vmax.f32 %v657_v61, %v693_v3  ;;  %v738_v50 = vmax.f32 %v698_v40, %v734_v54 }
 0x161   :  { %v745_v53 = vpop.permute.xlu1 %744 }
 0x162   :  { %v749_v5 = vadd.f32 %v745_v53, %v733_v27  ;;  %v750_v59 = vadd.f32 %v745_v53, %v734_v54  ;;  %v713_v11 = vmin.f32 %v673_v16, %v709_v37  ;;  %v714_v63 = vmin.f32 %v674_v45, %v710_v1 }
 0x163   :  { %v737_v57 = vmax.f32 %v697_v52, %v733_v27 }
 0x164   :  { %v753_v33 = vmin.f32 %v713_v11, %v749_v5  ;;  %v754_v24 = vmin.f32 %v714_v63, %v750_v59 }
 0x166   :  { %v758_v56 = vpop.permute.xlu1 %757  ;;  %v767_v25 = vmul.f32 %v763_v35, %v753_v33  ;;  %v768_v21 = vmul.f32 %v763_v35, %v754_v24 }
 0x167   :  { %v765_v38 = vmul.f32 %v758_v56, %v751_v48  ;;  %v766_v6 = vmul.f32 %v758_v56, %v752_v0 }
 0x16b   :  { %v771_v10 = vpop.permute.xlu1 %770 }
 0x16c   :  { %v777_v8 = vmul.f32 %v771_v10, %v735_v9  ;;  %v778_v55 = vmul.f32 %v771_v10, %v736_v49 }
 0x16e   :  { %v781_v13 = vmax.f32 %v765_v38, %v777_v8  ;;  %v782_v14 = vmax.f32 %v766_v6, %v778_v55 }
 0x16f   :  { %v775_v39 = vpop.permute.xlu1 %774 }
 0x170   :  { %785 = vst [vmem:[#allocation5] sm:$0xff] %v781_v13  ;;  %786 = vst [vmem:[#allocation5 + $0x8] sm:$0xff] %v782_v14  ;;  %v779_v12 = vmul.f32 %v775_v39, %v737_v57  ;;  %v780_v51 = vmul.f32 %v775_v39, %v738_v50 }
 0x172   :  { %v783_v34 = vmax.f32 %v767_v25, %v779_v12  ;;  %v784_v42 = vmax.f32 %v768_v21, %v780_v51 }
 0x174   :  { %787 = vst [vmem:[#allocation5 + $0x10] sm:$0xff] %v783_v34  ;;  %788 = vst [vmem:[#allocation5 + $0x18] sm:$0xff] %v784_v42 }
 0x175   :  { %938 = shalt.err (!%p935_p12)
}
 0x176   :  { %s939_s19 = scalar_lea.hbm %s1541_s5, 512 }
 0x177   :  { %p940_p13 = scmp.ne.s32.totalorder %s1541_s5, %s939_s19  ;;  %p943_p0 = scmp.lt.u32.totalorder %s939_s19, %s1541_s5 }
 0x179   :  { %p945_p1 = pnand %p943_p0, %p940_p13 }
 0x17b   :  { %948 = shalt.err (!%p945_p1)
}
 0x17c   :  { %800 = dma.vmem_to_hbm [thread:$0]  %s795_s15, 512, %s1541_s5, [#allocation4], %s954_s28, %s954_s28, %s955_s29  }
 0x17d   :  { %951 = dma.done.wait [#allocation4], 512  }
 0x17e   :  { %952 = vsyncadd [#allocation4], 4294966784 }
 0x17f   :  { %804 = vsyncpa [#allocation3], 1 }
 0x180   :  { %805 = vsyncpa [#allocation4], 1 }

</bundles_post_ra>
